<compile_context>
chip_gen: v5e
topology: v5e:2x2
jax: 0.10.0
libtpu: 0.0.40
codegen_flags: <defaults>
</compile_context>

<pallas_src>
import math

import jax
import jax.numpy as jnp
from jax.experimental import pallas as pl
from jax.experimental.pallas import tpu as pltpu


# ------------------------------ Pallas kernel ------------------------------
def _pcnn_fused_kernel(x_ref, w_ref, b_ref, m_ref, o_ref):
    # x_ref: (tb, H_pad, W)    height-padded input rows (compute dtype, bf16)
    # w_ref: (kh, W, C_pad)    conv weight, channel-padded (compute dtype)
    # b_ref: (1, C_pad)        conv bias (f32)
    # m_ref: (tb, H_out, 3)    piecewise mask (f32, values 0 / 100)
    # o_ref: (tb, 3, C_pad)    ReLU(piecewise-max-pool(conv + bias)) (f32)
    tb = x_ref.shape[0]
    w_in = x_ref.shape[2]
    kh = w_ref.shape[0]
    c_pad = w_ref.shape[2]
    h_out = m_ref.shape[1]

    # --- conv as kh shifted matmuls, f32 accumulation on the MXU ------------
    acc = jnp.zeros((tb * h_out, c_pad), jnp.float32)
    for r in range(kh):                                   # static unroll
        x_r = x_ref[:, r:r + h_out, :].reshape(tb * h_out, w_in)
        acc = acc + jnp.dot(x_r, w_ref[r],
                            preferred_element_type=jnp.float32)
    acc = acc + b_ref[...]                                # (1, C_pad) broadcast
    conv = acc.reshape(tb, h_out, c_pad)                  # (tb, H_out, C_pad)

    # --- piecewise pooling: max_h(mask + conv) - 100, then ReLU -------------
    for p in range(3):                                    # static unroll
        m_p = m_ref[:, :, p:p + 1]                        # (tb, H_out, 1)
        pooled = jnp.max(conv + m_p, axis=1)              # (tb, C_pad)
        piece = jnp.maximum(pooled - 100.0, 0.0).astype(o_ref.dtype)
        o_ref[:, p:p + 1, :] = piece[:, None, :]          # lane-dense store


def _round_up(v, m):
    return (v + m - 1) // m * m


# ------------------------------- parameters --------------------------------
class PCNNParams:
    """Deterministic init mirroring nn.Conv2d defaults (uniform +-1/sqrt(fan_in))."""

    def __init__(self, key, out_channels, kernel_size):
        kh, kw = kernel_size
        bound = 1.0 / math.sqrt(1 * kh * kw)
        k_w, k_b = jax.random.split(key)
        # PyTorch layout: (out_channels, in_channels=1, kh, kw)
        self.weight = jax.random.uniform(
            k_w, (out_channels, 1, kh, kw), jnp.float32, -bound, bound)
        self.bias = jax.random.uniform(
            k_b, (out_channels,), jnp.float32, -bound, bound)


# -------------------------------- forward ----------------------------------
def pcnn_forward(params, embedding, mask, window_size,
                 compute_dtype=jnp.bfloat16):
    """Pallas implementation of PCNN.forward.

    embedding: (B, max_length, word_size + 2*pos_size)   (pre-unsqueeze input)
    mask:      (B, H_out, 3) piecewise mask (the module's config.mask)
    returns:   (B, 3 * hidden_size) = ReLU(piecewise max-pool of the conv)
    """
    B, H, W = embedding.shape
    kh = window_size
    pad_h = 1                                     # Conv2d padding = (1, 0)
    H_out = H + 2 * pad_h - kh + 1
    C = params.weight.shape[0]
    assert params.weight.shape == (C, 1, kh, W)
    assert mask.shape == (B, H_out, 3), (mask.shape, (B, H_out, 3))

    # channel padding -> lane-dense (multiple of 128) accumulators and stores
    C_pad = _round_up(C, 128)

    # weight -> (kh, W, C_pad) slices used by the shifted dots; bias -> (1, C_pad)
    w_k = jnp.transpose(params.weight[:, 0, :, :], (1, 2, 0))        # (kh, W, C)
    w_k = jnp.pad(w_k, ((0, 0), (0, 0), (0, C_pad - C))).astype(compute_dtype)
    b_p = jnp.pad(params.bias, (0, C_pad - C)).reshape(1, C_pad)
    b_p = b_p.astype(jnp.float32)

    # height zero-padding only (width padding is 0); bf16 inputs, f32 accumulate
    x_pad = jnp.pad(embedding, ((0, 0), (pad_h, pad_h), (0, 0)))
    x_pad = x_pad.astype(compute_dtype)                              # (B, H+2, W)
    mask_f = mask.astype(jnp.float32)

    # batch tiling: ~512 conv rows per grid step; grid is "parallel" (megacore)
    tb = max(1, min(B, 512 // max(H_out, 1)))
    B_pad = _round_up(B, tb)
    if B_pad != B:
        x_pad = jnp.pad(x_pad, ((0, B_pad - B), (0, 0), (0, 0)))
        mask_f = jnp.pad(mask_f, ((0, B_pad - B), (0, 0), (0, 0)))

    out = pl.pallas_call(
        _pcnn_fused_kernel,
        out_shape=jax.ShapeDtypeStruct((B_pad, 3, C_pad), jnp.float32),
        grid=(B_pad // tb,),
        in_specs=[
            pl.BlockSpec((tb, H + 2 * pad_h, W), lambda i: (i, 0, 0)),
            pl.BlockSpec((kh, W, C_pad), lambda i: (0, 0, 0)),   # resident weight
            pl.BlockSpec((1, C_pad), lambda i: (0, 0)),          # resident bias
            pl.BlockSpec((tb, H_out, 3), lambda i: (i, 0, 0)),
        ],
        out_specs=pl.BlockSpec((tb, 3, C_pad), lambda i: (i, 0, 0)),
        compiler_params=pltpu.CompilerParams(
            dimension_semantics=("parallel",),
            vmem_limit_bytes=32 * 1024 * 1024,
        ),
    )(x_pad, w_k, b_p, mask_f)

    # (B, 3, C) -> (B, C, 3) -> (B, 3*C) matches x.view(-1, hidden*3) on the
    # (B, hidden, 3) PyTorch tensor.  This is a tiny reorder on the pooled
    # output only; the full conv activations never touch HBM.
    out = out[:B, :, :C]
    return jnp.transpose(out, (0, 2, 1)).reshape(B, 3 * C)


# ---------------------------------- main ------------------------------------
if __name__ == "__main__":
    # config: max_length=16, word_size=8, pos_size=4, window_size=3, hidden=32
    max_length, word_size, pos_size = 16, 8, 4
    window_size, hidden_size = 3, 32
    in_width = word_size + 2 * pos_size              # 16
    B = 2

    key = jax.random.PRNGKey(0)
    k_params, k_input = jax.random.split(key)
    params = PCNNParams(k_params, hidden_size, (window_size, in_width))
    embedding = jax.random.normal(
        k_input, (B, max_length, in_width), jnp.float32)

    # piecewise mask (config.mask): one_hot(segment) * 100, segments split at
    # fixed entity positions — standard PCNN mask construction.
    e1 = jnp.array([4, 6])
    e2 = jnp.array([9, 11])
    hs = jnp.arange(max_length)
    seg = ((hs[None, :] > e1[:, None]).astype(jnp.int32)
           + (hs[None, :] > e2[:, None]).astype(jnp.int32))      # (B, H) in {0,1,2}
    mask = jax.nn.one_hot(seg, 3, dtype=jnp.float32) * 100.0     # (B, H, 3)

    out = pcnn_forward(params, embedding, mask, window_size)
    out = jax.block_until_ready(out)

    # pure-JAX f32 reference with exact PyTorch PCNN semantics
    conv = jax.lax.conv_general_dilated(
        embedding[:, None, :, :], params.weight,
        window_strides=(1, 1), padding=((1, 1), (0, 0)),
        dimension_numbers=("NCHW", "OIHW", "NCHW"),
    ) + params.bias.reshape(1, hidden_size, 1, 1)                # (B, C, H, 1)
    pooled = jnp.max(mask[:, None, :, :] + conv, axis=2) - 100.0  # (B, C, 3)
    ref = jax.nn.relu(pooled).reshape(B, hidden_size * 3)
    ref = jax.block_until_ready(ref)

    assert out.shape == (B, 3 * hidden_size), out.shape
    max_err = float(jnp.max(jnp.abs(out - ref)))
    assert jnp.allclose(out, ref, atol=2e-2, rtol=2e-2), max_err  # bf16 matmul tol
    print("KERNEL_OK")
</pallas_src>

<mosaic_0001>
module attributes {stable_mosaic.version = 11 : i64} {
  func.func @_pcnn_fused_kernel(%arg0: i32, %arg1: memref<2x18x16xbf16, #tpu.memory_space<vmem>>, %arg2: memref<3x16x128xbf16, #tpu.memory_space<vmem>>, %arg3: memref<1x128xf32, #tpu.memory_space<vmem>>, %arg4: memref<2x16x3xf32, #tpu.memory_space<vmem>>, %arg5: memref<2x3x128xf32, #tpu.memory_space<vmem>>) attributes {dimension_semantics = [#tpu.dimension_semantics<parallel>], iteration_bounds = array<i64: 1>, scalar_prefetch = 0 : i64, scratch_operands = 0 : i64, tpu.core_type = #tpu.core_type<tc>, window_params = [{transform_indices = @transform_0, window_bounds = array<i64: 2, 18, 16>}, {pipeline_mode = #tpu.pipeline_mode<synchronous>, transform_indices = @transform_1, window_bounds = array<i64: 3, 16, 128>}, {pipeline_mode = #tpu.pipeline_mode<synchronous>, transform_indices = @transform_2, window_bounds = array<i64: 1, 128>}, {transform_indices = @transform_3, window_bounds = array<i64: 2, 16, 3>}, {transform_indices = @transform_4, window_bounds = array<i64: 2, 3, 128>}]} {
    %cst = arith.constant 0.000000e+00 : f32
    %0 = vector.broadcast %cst : f32 to vector<32x128xf32>
    %c0 = arith.constant 0 : index
    %c0_0 = arith.constant 0 : index
    %c0_1 = arith.constant 0 : index
    %1 = vector.load %arg1[%c0, %c0_0, %c0_1] : memref<2x18x16xbf16, #tpu.memory_space<vmem>>, vector<2x16x16xbf16>
    %2 = vector.shape_cast %1 : vector<2x16x16xbf16> to vector<32x16xbf16>
    %c0_2 = arith.constant 0 : index
    %c0_3 = arith.constant 0 : index
    %c0_4 = arith.constant 0 : index
    %3 = vector.load %arg2[%c0_2, %c0_3, %c0_4] : memref<3x16x128xbf16, #tpu.memory_space<vmem>>, vector<1x16x128xbf16>
    %4 = vector.shape_cast %3 : vector<1x16x128xbf16> to vector<16x128xbf16>
    %cst_5 = arith.constant dense<0.000000e+00> : vector<32x128xf32>
    %5 = tpu.matmul %2, %4, %cst_5 {dimension_numbers = #tpu.dot_dimension_numbers<[1], [0], [0], [1], [0, 0, 1, 1], [], []>} : vector<32x16xbf16>, vector<16x128xbf16>, vector<32x128xf32> -> vector<32x128xf32>
    %6 = arith.addf %0, %5 : vector<32x128xf32>
    %c0_6 = arith.constant 0 : index
    %c1 = arith.constant 1 : index
    %c0_7 = arith.constant 0 : index
    %7 = vector.load %arg1[%c0_6, %c1, %c0_7] : memref<2x18x16xbf16, #tpu.memory_space<vmem>>, vector<2x16x16xbf16>
    %8 = vector.shape_cast %7 : vector<2x16x16xbf16> to vector<32x16xbf16>
    %c1_8 = arith.constant 1 : index
    %c0_9 = arith.constant 0 : index
    %c0_10 = arith.constant 0 : index
    %9 = vector.load %arg2[%c1_8, %c0_9, %c0_10] : memref<3x16x128xbf16, #tpu.memory_space<vmem>>, vector<1x16x128xbf16>
    %10 = vector.shape_cast %9 : vector<1x16x128xbf16> to vector<16x128xbf16>
    %cst_11 = arith.constant dense<0.000000e+00> : vector<32x128xf32>
    %11 = tpu.matmul %8, %10, %cst_11 {dimension_numbers = #tpu.dot_dimension_numbers<[1], [0], [0], [1], [0, 0, 1, 1], [], []>} : vector<32x16xbf16>, vector<16x128xbf16>, vector<32x128xf32> -> vector<32x128xf32>
    %12 = arith.addf %6, %11 : vector<32x128xf32>
    %c0_12 = arith.constant 0 : index
    %c2 = arith.constant 2 : index
    %c0_13 = arith.constant 0 : index
    %13 = vector.load %arg1[%c0_12, %c2, %c0_13] : memref<2x18x16xbf16, #tpu.memory_space<vmem>>, vector<2x16x16xbf16>
    %14 = vector.shape_cast %13 : vector<2x16x16xbf16> to vector<32x16xbf16>
    %c2_14 = arith.constant 2 : index
    %c0_15 = arith.constant 0 : index
    %c0_16 = arith.constant 0 : index
    %15 = vector.load %arg2[%c2_14, %c0_15, %c0_16] : memref<3x16x128xbf16, #tpu.memory_space<vmem>>, vector<1x16x128xbf16>
    %16 = vector.shape_cast %15 : vector<1x16x128xbf16> to vector<16x128xbf16>
    %cst_17 = arith.constant dense<0.000000e+00> : vector<32x128xf32>
    %17 = tpu.matmul %14, %16, %cst_17 {dimension_numbers = #tpu.dot_dimension_numbers<[1], [0], [0], [1], [0, 0, 1, 1], [], []>} : vector<32x16xbf16>, vector<16x128xbf16>, vector<32x128xf32> -> vector<32x128xf32>
    %18 = arith.addf %12, %17 : vector<32x128xf32>
    %c0_18 = arith.constant 0 : index
    %c0_19 = arith.constant 0 : index
    %19 = vector.load %arg3[%c0_18, %c0_19] : memref<1x128xf32, #tpu.memory_space<vmem>>, vector<1x128xf32>
    %20 = vector.broadcast %19 : vector<1x128xf32> to vector<32x128xf32>
    %21 = arith.addf %18, %20 : vector<32x128xf32>
    %22 = vector.shape_cast %21 : vector<32x128xf32> to vector<2x16x128xf32>
    %c0_20 = arith.constant 0 : index
    %c0_21 = arith.constant 0 : index
    %c0_22 = arith.constant 0 : index
    %23 = vector.load %arg4[%c0_20, %c0_21, %c0_22] : memref<2x16x3xf32, #tpu.memory_space<vmem>>, vector<2x16x1xf32>
    %24 = vector.broadcast %23 : vector<2x16x1xf32> to vector<2x16x128xf32>
    %25 = arith.addf %22, %24 : vector<2x16x128xf32>
    %cst_23 = arith.constant dense<0xFF800000> : vector<2x128xf32>
    %26 = vector.multi_reduction <maximumf>, %25, %cst_23 [1] : vector<2x16x128xf32> to vector<2x128xf32>
    %cst_24 = arith.constant 1.000000e+02 : f32
    %27 = vector.broadcast %cst_24 : f32 to vector<2x128xf32>
    %28 = arith.subf %26, %27 : vector<2x128xf32>
    %cst_25 = arith.constant 0.000000e+00 : f32
    %29 = vector.broadcast %cst_25 : f32 to vector<2x128xf32>
    %30 = arith.maximumf %28, %29 : vector<2x128xf32>
    %31 = vector.shape_cast %30 : vector<2x128xf32> to vector<2x1x128xf32>
    %c0_26 = arith.constant 0 : index
    %c0_27 = arith.constant 0 : index
    %c0_28 = arith.constant 0 : index
    %32 = vector.load %arg5[%c0_26, %c0_27, %c0_28] : memref<2x3x128xf32, #tpu.memory_space<vmem>>, vector<2x1x128xf32>
    tpu.vector_store %arg5[%c0_26, %c0_27, %c0_28], %31 {strides = array<i32>} : memref<2x3x128xf32, #tpu.memory_space<vmem>>, vector<2x1x128xf32>,
    %c0_29 = arith.constant 0 : index
    %c0_30 = arith.constant 0 : index
    %c1_31 = arith.constant 1 : index
    %33 = vector.load %arg4[%c0_29, %c0_30, %c1_31] : memref<2x16x3xf32, #tpu.memory_space<vmem>>, vector<2x16x1xf32>
    %34 = vector.broadcast %33 : vector<2x16x1xf32> to vector<2x16x128xf32>
    %35 = arith.addf %22, %34 : vector<2x16x128xf32>
    %cst_32 = arith.constant dense<0xFF800000> : vector<2x128xf32>
    %36 = vector.multi_reduction <maximumf>, %35, %cst_32 [1] : vector<2x16x128xf32> to vector<2x128xf32>
    %cst_33 = arith.constant 1.000000e+02 : f32
    %37 = vector.broadcast %cst_33 : f32 to vector<2x128xf32>
    %38 = arith.subf %36, %37 : vector<2x128xf32>
    %cst_34 = arith.constant 0.000000e+00 : f32
    %39 = vector.broadcast %cst_34 : f32 to vector<2x128xf32>
    %40 = arith.maximumf %38, %39 : vector<2x128xf32>
    %41 = vector.shape_cast %40 : vector<2x128xf32> to vector<2x1x128xf32>
    %c0_35 = arith.constant 0 : index
    %c1_36 = arith.constant 1 : index
    %c0_37 = arith.constant 0 : index
    %42 = vector.load %arg5[%c0_35, %c1_36, %c0_37] : memref<2x3x128xf32, #tpu.memory_space<vmem>>, vector<2x1x128xf32>
    tpu.vector_store %arg5[%c0_35, %c1_36, %c0_37], %41 {strides = array<i32>} : memref<2x3x128xf32, #tpu.memory_space<vmem>>, vector<2x1x128xf32>,
    %c0_38 = arith.constant 0 : index
    %c0_39 = arith.constant 0 : index
    %c2_40 = arith.constant 2 : index
    %43 = vector.load %arg4[%c0_38, %c0_39, %c2_40] : memref<2x16x3xf32, #tpu.memory_space<vmem>>, vector<2x16x1xf32>
    %44 = vector.broadcast %43 : vector<2x16x1xf32> to vector<2x16x128xf32>
    %45 = arith.addf %22, %44 : vector<2x16x128xf32>
    %cst_41 = arith.constant dense<0xFF800000> : vector<2x128xf32>
    %46 = vector.multi_reduction <maximumf>, %45, %cst_41 [1] : vector<2x16x128xf32> to vector<2x128xf32>
    %cst_42 = arith.constant 1.000000e+02 : f32
    %47 = vector.broadcast %cst_42 : f32 to vector<2x128xf32>
    %48 = arith.subf %46, %47 : vector<2x128xf32>
    %cst_43 = arith.constant 0.000000e+00 : f32
    %49 = vector.broadcast %cst_43 : f32 to vector<2x128xf32>
    %50 = arith.maximumf %48, %49 : vector<2x128xf32>
    %51 = vector.shape_cast %50 : vector<2x128xf32> to vector<2x1x128xf32>
    %c0_44 = arith.constant 0 : index
    %c2_45 = arith.constant 2 : index
    %c0_46 = arith.constant 0 : index
    %52 = vector.load %arg5[%c0_44, %c2_45, %c0_46] : memref<2x3x128xf32, #tpu.memory_space<vmem>>, vector<2x1x128xf32>
    tpu.vector_store %arg5[%c0_44, %c2_45, %c0_46], %51 {strides = array<i32>} : memref<2x3x128xf32, #tpu.memory_space<vmem>>, vector<2x1x128xf32>,
    return
  }
  func.func @transform_0(%arg0: i32) -> (i32, i32, i32) {
    %c0_i32 = arith.constant 0 : i32
    %c0_i32_0 = arith.constant 0 : i32
    %c0_i32_1 = arith.constant 0 : i32
    return %arg0, %c0_i32, %c0_i32_0 : i32, i32, i32
  }
  func.func @transform_1(%arg0: i32) -> (i32, i32, i32) {
    %c0_i32 = arith.constant 0 : i32
    %c0_i32_0 = arith.constant 0 : i32
    %c0_i32_1 = arith.constant 0 : i32
    %c0_i32_2 = arith.constant 0 : i32
    return %c0_i32, %c0_i32_0, %c0_i32_1 : i32, i32, i32
  }
  func.func @transform_2(%arg0: i32) -> (i32, i32) {
    %c0_i32 = arith.constant 0 : i32
    %c0_i32_0 = arith.constant 0 : i32
    %c0_i32_1 = arith.constant 0 : i32
    return %c0_i32, %c0_i32_0 : i32, i32
  }
  func.func @transform_3(%arg0: i32) -> (i32, i32, i32) {
    %c0_i32 = arith.constant 0 : i32
    %c0_i32_0 = arith.constant 0 : i32
    %c0_i32_1 = arith.constant 0 : i32
    return %arg0, %c0_i32, %c0_i32_0 : i32, i32, i32
  }
  func.func @transform_4(%arg0: i32) -> (i32, i32, i32) {
    %c0_i32 = arith.constant 0 : i32
    %c0_i32_0 = arith.constant 0 : i32
    %c0_i32_1 = arith.constant 0 : i32
    return %arg0, %c0_i32, %c0_i32_0 : i32, i32, i32
  }
}

</mosaic_0001>

<bundles_post_ra>
// kernel: tpu_custom_call.1
= control target key start
LH: loop header
LB: loop body
LE: loop exit
PB: predicated region body
PF: predicated region fallthrough
CT: control target
= control target key end

     0   :  { %vm92_vm0 = vcmask 130048   ;;  %vm165_vm1 = vcmask 1042432   ;;  %vm166_vm2 = vcmask 1046532   ;;  %v438_v3 = vmov 0   ;;  %s585_s1 = inlined_call_operand.vmem [shape: bf16[3,16,128], index: 1, kind: input, shape index: {}]   ;;  %s586_s0 = inlined_call_operand.vmem [shape: bf16[2,18,16], index: 0, kind: input, shape index: {}]   ;;  %s587_s3 = inlined_call_operand.vmem [shape: f32[2,16,3], index: 3, kind: input, shape index: {}]   ;;  %s588_s2 = inlined_call_operand.vmem [shape: f32[1,128], index: 2, kind: input, shape index: {}]   ;;  %s589_s4 = inlined_call_operand.vmem [shape: f32[2,3,128], index: 4, kind: output, shape index: {}]  }
   0x1   :  { %v422_v0 = vld [vmem:[%s585_s1] sm:$0xff]  ;;  %v424_v2 = vld [vmem:[%s585_s1 + $0x10] sm:$0xff]  ;;  %430 = vset.pattern.permute.xlu1 %v438_v3  ;;  %vm26_vm3 = vsmask.f32 3328  ;;  %429 = vset.pattern.permute.xlu0 %v438_v3  ;;  %v24_v5 = vld [vmem:[%s586_s0 + $0x8] sm:$0x1] }
   0x2   :  { %v420_v1 = vld [vmem:[%s586_s0] sm:$0xff]  ;;  %v439_v7 = vmov 1   ;;  %147 = vmatpush.bf16.msra.mxu1 %v422_v0  ;;  %210 = vmatpush.bf16.msra.mxu2 %v424_v2  ;;  %vm487_vm4 = vmor %vm165_vm1, %vm166_vm2  ;;  %v173_v11 = vrot.slane %v24_v5, 5  ;;  %v423_v12 = vld [vmem:[%s585_s1 + $0x8] sm:$0xff]  ;;  %vm27_vm5 = vsmask.f32 7440 }
   0x3   :  { %v19_v4 = vld [vmem:[%s586_s0 + $0x4] sm:$0xf]  ;;  %v159_v6 = vld [vmem:[%s586_s0] sm:$0xe]  ;;  %431 = vset.pattern.permute.xlu2 %v439_v7  ;;  %v497_v13 = vld [vmem:[%s587_s3 + $0x10] sm:$0xff]  ;;  %v49_v17 = vshll.u32 %v24_v5, 16  ;;  %106 = vmatpush.bf16.msra.mxu0 %v423_v12 }
   0x4   :  { %v404_v9 = vrot.slane %v159_v6, 9  ;;  %v170_v10 = vrot.slane %v19_v4, 5  ;;  %v39_v14 = vshll.u32 %v19_v4, 16  ;;  %250 = vperm.xlu1 %430, %v497_v13   ;;  %v18_v15 = vld [vmem:[%s586_s0] sm:$0xf]  ;;  %v43_v16 = vshrl.u32 %v19_v4, 16  ;;  %425 = vmatpush.bf16.msra.mxu3 %v423_v12  ;;  %vm526_vm6 = vmor %vm26_vm3, %vm27_vm5 }
   0x5   :  { %v30_v20 = vshrl.u32 %v18_v15, 16  ;;  %v33_v21 = vshll.u32 %v18_v15, 16  ;;  %v20_v22 = vld [vmem:[%s586_s0 + $0xc] sm:$0xf]  ;;  %402 = vmatmul.msk.bf16.vlgmr.msra.gmra.mxu1 %vm92_vm0, %v420_v1  ;;  %v51_v26 = vrot.slane %v49_v17, 5  ;;  %v515_v28 = vld [vmem:[%s587_s3] sm:$0xff] }
   0x6   :  { %v171_v18 = vsel %vm487_vm4, %v404_v9, %v170_v10  ;;  %v172_v19 = vrot.slane %v170_v10, 4  ;;  %v41_v24 = vrot.slane %v39_v14, 5  ;;  %v45_v25 = vrot.slane %v43_v16, 4  ;;  %v21_v27 = vld [vmem:[%s586_s0 + $0x10] sm:$0xf]  ;;  %240 = vperm.xlu0 %429, %v515_v28   ;;  %288 = vperm.xlu2 %431, %v515_v28   ;;  %v237_v43 = vld [vmem:[%s587_s3 + $0x18] sm:$0xff] }
   0x7   :  { %v185_v23 = vunpack.c.l.b16 %v171_v18  ;;  %v32_v30 = vrot.slane %v30_v20, 4  ;;  %v35_v31 = vrot.slane %v33_v21, 5  ;;  %v25_v32 = vld [vmem:[%s586_s0 + $0x14] sm:$0x1]  ;;  %v54_v33 = vshrl.u32 %v20_v22, 16  ;;  %v235_v56 = vld [vmem:[%s587_s3 + $0x8] sm:$0xff] }
   0x8   :  { %v174_v29 = vsel %vm487_vm4, %v172_v19, %v173_v11  ;;  %v46_v35 = vor.u32 %v45_v25, %v41_v24  ;;  %v57_v36 = vshll.u32 %v20_v22, 16  ;;  %v63_v37 = vshll.u32 %v21_v27, 16  ;;  %v160_v44 = vld [vmem:[%s586_s0 + $0xc] sm:$0xe] }
   0x9   :  { %v186_v34 = vunpack.c.l.b16 %v174_v29  ;;  %v36_v39 = vor.u32 %v35_v31, %v32_v30  ;;  %v56_v40 = vrot.slane %v54_v33, 4  ;;  %v67_v41 = vshrl.u32 %v21_v27, 16  ;;  %v421_v10 = vld [vmem:[%s586_s0 + $0xc] sm:$0xff] }
   0xa   :  { %v73_v42 = vshll.u32 %v25_v32, 16  ;;  %v47_v46 = vrot.slane %v46_v35, 4  ;;  %v59_v47 = vrot.slane %v57_v36, 5  ;;  %v65_v48 = vrot.slane %v63_v37, 5 }
   0xb   :  { %v189_v45 = vpack.c.b16 %v186_v34, %v185_v23  ;;  %v37_v49 = vrot.slane %v36_v39, 4  ;;  %v69_v50 = vrot.slane %v67_v41, 4  ;;  %v405_v54 = vrot.slane %v160_v44, 9 }
   0xc   :  { %v75_v51 = vrot.slane %v73_v42, 5  ;;  %v52_v52 = vsel %vm526_vm6, %v47_v46, %v51_v26  ;;  %v60_v53 = vor.u32 %v59_v47, %v56_v40  ;;  %255 = vperm.xlu1 %430, %v237_v43   ;;  %v177_v55 = vrot.slane %v21_v27, 5  ;;  %v437_v27 = vld [vmem:[%s588_s2] ss:$0 sm:$0xff] }
   0xd   :  { %412 = vmatmul.msk.bf16.vlgmr.msra.gmra.mxu2 %vm92_vm0, %v189_v45  ;;  %v42_v57 = vsel %vm526_vm6, %v37_v49, %v41_v24  ;;  %v81_v58 = vunpack.c.l.b16 %v52_v52  ;;  %v70_v59 = vor.u32 %v69_v50, %v65_v48  ;;  %v180_v60 = vrot.slane %v25_v32, 5 }
   0xe   :  { %v80_v61 = vunpack.c.l.b16 %v42_v57  ;;  %v61_v62 = vrot.slane %v60_v53, 4  ;;  %v179_v63 = vrot.slane %v177_v55, 4  ;;  %245 = vperm.xlu0 %429, %v235_v56   ;;  %293 = vperm.xlu2 %431, %v235_v56   ;;  %v178_v5 = vsel %vm487_vm4, %v405_v54, %v177_v55 }
   0xf   :  { %v71_v0 = vrot.slane %v70_v59, 4  ;;  %v187_v12 = vunpack.c.l.b16 %v178_v5  ;;  %v440_v8 = vmov 2  }
  0x10   :  { %v84_v1 = vpack.c.b16 %v81_v58, %v80_v61  ;;  %v66_v2 = vsel %vm526_vm6, %v61_v62, %v65_v48  ;;  %v181_v6 = vsel %vm487_vm4, %v179_v63, %v180_v60 }
  0x11   :  { %v76_v3 = vsel %vm526_vm6, %v71_v0, %v75_v51  ;;  %v82_v4 = vunpack.c.l.b16 %v66_v2  ;;  %v188_v14 = vunpack.c.l.b16 %v181_v6 }
  0x12   :  { %388 = vmatmul.msk.bf16.vlgmr.msra.gmra.mxu0 %vm92_vm0, %v84_v1  ;;  %v83_v9 = vunpack.c.l.b16 %v76_v3 }
  0x13   :  { %v190_v15 = vpack.c.b16 %v188_v14, %v187_v12 }
  0x14   :  { %v85_v11 = vpack.c.b16 %v83_v9, %v82_v4  ;;  %433 = vset.pattern.permute.xlu1 %v439_v7 }
  0x15   :  { %303 = vperm.xlu1 %433, %v237_v43   ;;  %403 = vmatmul.msk.bf16.gmra.mxu1 %vm92_vm0, %v421_v10 }
  0x16   :  { %389 = vmatmul.msk.bf16.vlgmr.msra.gmra.mxu3 %vm92_vm0, %v85_v11  ;;  %432 = vset.pattern.permute.xlu0 %v439_v7 }
  0x17   :  { %434 = vset.pattern.permute.xlu2 %v440_v8  ;;  %298 = vperm.xlu0 %432, %v497_v13  }
  0x18   :  { %336 = vperm.xlu2 %434, %v515_v28  }
  0x1d   :  { %413 = vmatmul.msk.bf16.gmra.mxu2 %vm92_vm0, %v190_v15  ;;  %435 = vset.pattern.permute.xlu1 %v440_v8 }
  0x1e   :  { %341 = vperm.xlu1 %435, %v235_v56  }
  0x1f   :  { %436 = vset.pattern.permute.xlu0 %v440_v8 }
  0x20   :  { %346 = vperm.xlu2 %434, %v497_v13   ;;  %351 = vperm.xlu0 %436, %v237_v43  }
  0x60   :  { %v289_v18 = vpop.permute.xlu2 %288 }
  0x68   :  { %v294_v23 = vpop.permute.xlu2 %293 }
  0x72   :  { %v337_v35 = vpop.permute.xlu2 %336 }
  0x76   :  { %v251_v16 = vpop.permute.xlu1 %250 }
  0x78   :  { %v241_v7 = vpop.permute.xlu0 %240 }
  0x7a   :  { %v347_v10 = vpop.permute.xlu2 %346 }
  0x7e   :  { %v256_v19 = vpop.permute.xlu1 %255 }
  0x80   :  { %v246_v13 = vpop.permute.xlu0 %245 }
  0x82   :  { %v149_v17 = vpop.f32.mrf.mxu1 }
  0x87   :  { %v304_v25 = vpop.permute.xlu1 %303 }
  0x89   :  { %v299_v49 = vpop.permute.xlu0 %298 }
  0x8a   :  { %v151_v20 = vpop.f32.mrf.mxu1 }
  0x8f   :  { %v108_v21 = vpop.f32.mrf.mxu0 }
  0x90   :  { %v212_v22 = vpop.f32.mrf.mxu2  ;;  %v150_v24 = vadd.f32 %v149_v17, %v108_v21  ;;  %v342_v36 = vpop.permute.xlu1 %341 }
  0x92   :  { %v222_v26 = vadd.f32 %v212_v22, %v150_v24  ;;  %v154_v33 = vpop.f32.mrf.mxu1  ;;  %v352_v12 = vpop.permute.xlu0 %351 }
  0x94   :  { %v230_v31 = vadd.f32 %v437_v27, %v222_v26 }
  0x96   :  { %v258_v38 = vadd.f32 %v241_v7, %v230_v31  ;;  %v306_v39 = vadd.f32 %v289_v18, %v230_v31  ;;  %v354_v40 = vadd.f32 %v337_v35, %v230_v31 }
  0x97   :  { %v110_v28 = vpop.f32.mrf.mxu0 }
  0x98   :  { %v214_v29 = vpop.f32.mrf.mxu2  ;;  %v152_v30 = vadd.f32 %v151_v20, %v110_v28 }
  0x99   :  { %v113_v32 = vpop.f32.mrf.mxu3 }
  0x9a   :  { %v223_v34 = vadd.f32 %v214_v29, %v152_v30  ;;  %v155_v44 = vadd.f32 %v154_v33, %v113_v32  ;;  %v156_v54 = vpop.f32.mrf.mxu1 }
  0x9c   :  { %v231_v37 = vadd.f32 %v437_v27, %v223_v34 }
  0x9e   :  { %v259_v41 = vadd.f32 %v246_v13, %v231_v37  ;;  %v307_v42 = vadd.f32 %v294_v23, %v231_v37  ;;  %v355_v43 = vadd.f32 %v342_v36, %v231_v37 }
  0xa0   :  { %v217_v45 = vpop.f32.mrf.mxu2  ;;  %v262_v46 = vmax.f32 %v258_v38, %v259_v41  ;;  %v310_v47 = vmax.f32 %v306_v39, %v307_v42  ;;  %v358_v48 = vmax.f32 %v354_v40, %v355_v43 }
  0xa1   :  { %v115_v53 = vpop.f32.mrf.mxu3  ;;  %v224_v55 = vadd.f32 %v217_v45, %v155_v44 }
  0xa2   :  { %v263_v50 = vrot.slane %v262_v46, 4  ;;  %v311_v51 = vrot.slane %v310_v47, 4  ;;  %v359_v52 = vrot.slane %v358_v48, 4  ;;  %v157_v62 = vadd.f32 %v156_v54, %v115_v53 }
  0xa3   :  { %v232_v63 = vadd.f32 %v437_v27, %v224_v55 }
  0xa4   :  { %v264_v56 = vmax.f32 %v262_v46, %v263_v50  ;;  %v312_v57 = vmax.f32 %v310_v47, %v311_v51  ;;  %v360_v58 = vmax.f32 %v358_v48, %v359_v52 }
  0xa5   :  { %v260_v14 = vadd.f32 %v251_v16, %v232_v63  ;;  %v308_v7 = vadd.f32 %v299_v49, %v232_v63  ;;  %v356_v20 = vadd.f32 %v347_v10, %v232_v63 }
  0xa6   :  { %v265_v59 = vrot.slane %v264_v56, 2  ;;  %v313_v60 = vrot.slane %v312_v57, 2  ;;  %v361_v61 = vrot.slane %v360_v58, 2 }
  0xa8   :  { %v219_v0 = vpop.f32.mrf.mxu2  ;;  %v266_v1 = vmax.f32 %v264_v56, %v265_v59  ;;  %v314_v2 = vmax.f32 %v312_v57, %v313_v60  ;;  %v362_v3 = vmax.f32 %v360_v58, %v361_v61 }
  0xa9   :  { %v225_v4 = vadd.f32 %v219_v0, %v157_v62 }
  0xaa   :  { %v267_v5 = vrot.slane %v266_v1, 1  ;;  %v315_v6 = vrot.slane %v314_v2, 1  ;;  %v363_v9 = vrot.slane %v362_v3, 1 }
  0xab   :  { %v233_v11 = vadd.f32 %v437_v27, %v225_v4 }
  0xac   :  { %v268_v8 = vmax.f32 %v266_v1, %v267_v5  ;;  %v316_v15 = vmax.f32 %v314_v2, %v315_v6  ;;  %v364_v17 = vmax.f32 %v362_v3, %v363_v9 }
  0xad   :  { %v261_v18 = vadd.f32 %v256_v19, %v233_v11  ;;  %v309_v21 = vadd.f32 %v304_v25, %v233_v11  ;;  %v357_v22 = vadd.f32 %v352_v12, %v233_v11 }
  0xae   :  { %v414_v23 = vadd.f32 -100.0, %v268_v8  ;;  %v416_v24 = vadd.f32 -100.0, %v316_v15  ;;  %v418_v26 = vadd.f32 -100.0, %v364_v17 }
  0xaf   :  { %v269_v28 = vmax.f32 %v260_v14, %v261_v18  ;;  %v317_v29 = vmax.f32 %v308_v7, %v309_v21  ;;  %v365_v13 = vmax.f32 %v356_v20, %v357_v22 }
  0xb0   :  { %v278_v30 = vmax.f32 %v414_v23, 0.0  ;;  %v326_v31 = vmax.f32 %v416_v24, 0.0  ;;  %v374_v32 = vmax.f32 %v418_v26, 0.0 }
  0xb1   :  { %v270_v27 = vrot.slane %v269_v28, 4  ;;  %v318_v33 = vrot.slane %v317_v29, 4  ;;  %v366_v16 = vrot.slane %v365_v13, 4 }
  0xb2   :  { %280 = vst [vmem:[%s589_s4] sm:$0x1] %v278_v30 }
  0xb3   :  { %v271_v19 = vmax.f32 %v269_v28, %v270_v27  ;;  %328 = vst [vmem:[%s589_s4 + $0x1] sm:$0x1] %v326_v31  ;;  %v319_v25 = vmax.f32 %v317_v29, %v318_v33  ;;  %v367_v34 = vmax.f32 %v365_v13, %v366_v16 }
  0xb4   :  { %376 = vst [vmem:[%s589_s4 + $0x2] sm:$0x1] %v374_v32 }
  0xb5   :  { %v272_v35 = vrot.slane %v271_v19, 2  ;;  %v320_v36 = vrot.slane %v319_v25, 2  ;;  %v368_v37 = vrot.slane %v367_v34, 2 }
  0xb7   :  { %v273_v38 = vmax.f32 %v271_v19, %v272_v35  ;;  %v321_v39 = vmax.f32 %v319_v25, %v320_v36  ;;  %v369_v40 = vmax.f32 %v367_v34, %v368_v37 }
  0xb9   :  { %v274_v41 = vrot.slane %v273_v38, 1  ;;  %v322_v42 = vrot.slane %v321_v39, 1  ;;  %v370_v43 = vrot.slane %v369_v40, 1 }
  0xbb   :  { %v275_v44 = vmax.f32 %v273_v38, %v274_v41  ;;  %v323_v45 = vmax.f32 %v321_v39, %v322_v42  ;;  %v371_v46 = vmax.f32 %v369_v40, %v370_v43 }
  0xbd   :  { %v415_v47 = vadd.f32 -100.0, %v275_v44  ;;  %v417_v48 = vadd.f32 -100.0, %v323_v45  ;;  %v419_v49 = vadd.f32 -100.0, %v371_v46 }
  0xbf   :  { %v279_v50 = vmax.f32 %v415_v47, 0.0  ;;  %v327_v51 = vmax.f32 %v417_v48, 0.0  ;;  %v375_v52 = vmax.f32 %v419_v49, 0.0 }
  0xc1   :  { %281 = vst [vmem:[%s589_s4 + $0x4] sm:$0x1] %v279_v50 }
  0xc2   :  { %329 = vst [vmem:[%s589_s4 + $0x5] sm:$0x1] %v327_v51 }
  0xc3   :  { %377 = vst [vmem:[%s589_s4 + $0x6] sm:$0x1] %v375_v52 }

</bundles_post_ra>
